<compile_context>
chip_gen: v6e
topology: v6e:2x2x1
jax: 0.10.0
libtpu: 0.0.40
codegen_flags: <defaults>
</compile_context>

<pallas_src>
import numpy as np
import jax
import jax.numpy as jnp
from jax.experimental import pallas as pl
from jax.experimental.pallas import tpu as pltpu

NUM_BLOCKS = 5
NUM_LAYERS = NUM_BLOCKS + 1     # 5 hidden blocks + output linear
BN_EPS = 1e-5
LANES = 128                     # output columns padded to a multiple of this
SUBLANE_BF16 = 16               # bf16 sublane-packing granule for the batch tile


def _round_up(a, b):
    return (a + b - 1) // b * b


def _cdiv(a, b):
    return -(-a // b)


# --------------------------------------------------------------------------------------
# Kernel
# --------------------------------------------------------------------------------------
def seq_model_kernel(x_ref, *refs):
    """refs = [w0,b0, w1,b1, ..., w5,b5, out_ref].

    x_ref : bf16 (tile_m, input_size)
    w_i   : bf16 (in_i, out_i)  -- pre-transposed, previous block's eval-BN folded in
    b_i   : f32  (1, out_i)     -- folded bias (zeros for layer 0; final layer lane-padded)
    """
    out_ref = refs[-1]
    params = refs[:-1]

    h = x_ref[...]                                     # bf16 activations
    for i in range(NUM_LAYERS):
        w = params[2 * i][...]                         # bf16 -> MXU
        b = params[2 * i + 1][...]                     # f32 bias
        z = jnp.dot(h, w, preferred_element_type=jnp.float32) + b   # f32 accumulate
        if i < NUM_BLOCKS:
            h = jnp.maximum(z, 0.0).astype(jnp.bfloat16)   # ReLU, carry bf16 to next MXU op
        else:
            h = z                                          # output layer: no ReLU
    out_ref[...] = h.astype(out_ref.dtype)                 # lane-dense (multiple-of-128) store


# --------------------------------------------------------------------------------------
# Wrapper
# --------------------------------------------------------------------------------------
def _param_spec(shape, single_buffer):
    """VMEM-resident parameter block (constant index_map). With single_buffer=True we
    request a 1-deep pipeline buffer (no pointless double-buffering of static weights)."""
    index_map = lambda i: (0, 0)
    if single_buffer and hasattr(pl, "Buffered"):
        try:
            return pl.BlockSpec(shape, index_map, pipeline_mode=pl.Buffered(1))
        except TypeError:               # jax version without pipeline_mode kwarg
            pass
    return pl.BlockSpec(shape, index_map)


def _choose_tiling(batch, target_tile_m):
    """Pick (tile_m, padded_batch, grid) such that
       (a) per-step rows are large (amortize ~0.35us/step fixed overhead),
       (b) there are >=2 tiles whenever the batch can be split (v7x megacore sharding),
       (c) padding waste stays under one sublane group (no pad-to-multiple-of-tile)."""
    grid = max(1, _cdiv(batch, max(SUBLANE_BF16, target_tile_m)))
    if grid == 1 and batch >= 2 * SUBLANE_BF16:
        grid = 2
    tile_m = _round_up(_cdiv(batch, grid), SUBLANE_BF16)
    padded = tile_m * grid
    return tile_m, padded, grid


def seq_model_forward(x, fused_params, output_size, target_tile_m=2048):
    """x: (batch, input_size) f32/bf16.  fused_params: [w0,b0,...,w5,b5] from fold_params()."""
    batch, in_dim = x.shape
    out_cols = fused_params[-1].shape[1]               # lane-padded output width

    tile_m, padded, grid_m = _choose_tiling(batch, target_tile_m)

    # bf16 input streaming: the matmul consumes bf16 anyway, f32 x is wasted DMA.
    x = x.astype(jnp.bfloat16)
    if padded != batch:
        x = jnp.pad(x, ((0, padded - batch), (0, 0)))

    # Advisory cost estimate so XLA schedules this as the lightweight op it is.
    layer_dims = [(fused_params[2 * i].shape[0], fused_params[2 * i].shape[1])
                  for i in range(NUM_LAYERS)]
    flops = int(2 * padded * sum(di * do for di, do in layer_dims))
    param_bytes = sum(int(np.prod(p.shape)) * p.dtype.itemsize for p in fused_params)
    bytes_accessed = int(padded * in_dim * 2 + param_bytes + padded * out_cols * 4)
    cost = pl.CostEstimate(flops=flops, transcendentals=0, bytes_accessed=bytes_accessed)

    def build(single_buffer_params):
        in_specs = [pl.BlockSpec((tile_m, in_dim), lambda i: (i, 0))]
        for p in fused_params:
            in_specs.append(_param_spec(p.shape, single_buffer_params))
        out_specs = pl.BlockSpec((tile_m, out_cols), lambda i: (i, 0))
        return pl.pallas_call(
            seq_model_kernel,
            out_shape=jax.ShapeDtypeStruct((padded, out_cols), jnp.float32),
            grid_spec=pltpu.PrefetchScalarGridSpec(
                num_scalar_prefetch=0,
                grid=(grid_m,),
                in_specs=in_specs,
                out_specs=out_specs,
            ),
            compiler_params=pltpu.CompilerParams(
                dimension_semantics=("parallel",),       # batch tiles shard across TCs on v7x
                vmem_limit_bytes=32 * 1024 * 1024,       # covers large tiles on v5e (16 MiB default)
            ),
            cost_estimate=cost,
        )

    try:
        out = build(True)(x, *fused_params)
    except Exception:
        # Fallback for jax versions where single-buffered pipeline_mode is unsupported.
        out = build(False)(x, *fused_params)

    return out[:batch, :output_size]


# --------------------------------------------------------------------------------------
# Parameter construction (PyTorch-layout raw params) and constant folding
# --------------------------------------------------------------------------------------
def init_raw_params(key, input_size, output_size, hidden_size=128):
    """Synthetic params matching Seq_Model.__init__ shapes (PyTorch layout)."""
    blocks = []
    in_dim, hid = input_size, hidden_size
    for _ in range(NUM_BLOCKS):
        key, kw, kg, kb, km, kv = jax.random.split(key, 6)
        W = jax.random.normal(kw, (hid, in_dim), jnp.float32) * 0.1          # nn.Linear weight (out,in)
        gamma = jax.random.uniform(kg, (hid,), jnp.float32, 0.5, 1.5)        # BN weight
        beta = jax.random.normal(kb, (hid,), jnp.float32) * 0.1              # BN bias
        r_mean = jax.random.normal(km, (hid,), jnp.float32) * 0.1            # running_mean
        r_var = jax.random.uniform(kv, (hid,), jnp.float32, 0.5, 1.5)        # running_var
        blocks.append((W, gamma, beta, r_mean, r_var))
        in_dim, hid = hid, int(hid / 2)
    key, kw, kb = jax.random.split(key, 3)
    W_out = jax.random.normal(kw, (output_size, in_dim), jnp.float32) * 0.1
    b_out = jax.random.normal(kb, (output_size,), jnp.float32) * 0.1
    return blocks, (W_out, b_out)


def fold_params(raw, weight_dtype=jnp.bfloat16):
    """Fold each block's eval-mode BN into the next layer; pre-transpose & cast weights.
    The final layer's columns are zero-padded to a multiple of 128 for lane-dense stores."""
    blocks, (W_out, b_out) = raw
    fused = []
    scale_prev, shift_prev = None, None
    for (W, gamma, beta, mean, var) in blocks:
        w_t = W.T                                              # (in, out)
        if scale_prev is None:                                 # first layer: no preceding BN, no bias
            w_f = w_t
            b_f = jnp.zeros((1, w_t.shape[1]), jnp.float32)
        else:
            w_f = scale_prev[:, None] * w_t
            b_f = shift_prev[None, :] @ w_t
        fused += [w_f.astype(weight_dtype), b_f.astype(jnp.float32)]
        scale_prev = gamma / jnp.sqrt(var + BN_EPS)
        shift_prev = beta - mean * scale_prev
    w_t = W_out.T
    w_f = scale_prev[:, None] * w_t
    b_f = b_out[None, :] + shift_prev[None, :] @ w_t
    out_cols = w_f.shape[1]
    padded_cols = max(LANES, _round_up(out_cols, LANES))
    if padded_cols != out_cols:                                # zero-pad -> padded outputs are exactly 0
        w_f = jnp.pad(w_f, ((0, 0), (0, padded_cols - out_cols)))
        b_f = jnp.pad(b_f, ((0, 0), (0, padded_cols - out_cols)))
    fused += [w_f.astype(weight_dtype), b_f.astype(jnp.float32)]
    return fused


# --------------------------------------------------------------------------------------
# References
# --------------------------------------------------------------------------------------
def reference_forward_f32(x, raw):
    """Pure-JAX f32 reference with original (unfolded) PyTorch semantics, eval mode."""
    blocks, (W_out, b_out) = raw
    h = x
    for (W, gamma, beta, mean, var) in blocks:
        h = jnp.maximum(h @ W.T, 0.0)
        h = (h - mean) / jnp.sqrt(var + BN_EPS) * gamma + beta    # BN eval; dropout identity
    return h @ W_out.T + b_out


def reference_forward_fused(x, fused, output_size):
    """Pure-JAX reference mirroring the kernel numerics (bf16 folded params, f32 accum)."""
    h = x.astype(jnp.bfloat16)
    for i in range(NUM_LAYERS):
        w, b = fused[2 * i], fused[2 * i + 1]
        z = jnp.dot(h, w, preferred_element_type=jnp.float32) + b
        h = jnp.maximum(z, 0.0).astype(jnp.bfloat16) if i < NUM_BLOCKS else z
    return h[:, :output_size]


# --------------------------------------------------------------------------------------
if __name__ == "__main__":
    batch, input_size, output_size, hidden_size = 64, 64, 10, 128

    key = jax.random.PRNGKey(0)
    key, kx = jax.random.split(key)
    x = jax.random.normal(kx, (batch, input_size), jnp.float32)

    raw = init_raw_params(key, input_size, output_size, hidden_size)
    fused = fold_params(raw)

    # batch=64 -> 2 tiles of 32 rows (exercises the pipelined, megacore-shardable grid).
    out = seq_model_forward(x, fused, output_size, target_tile_m=2048)
    out = jax.block_until_ready(out)
    out_np = np.asarray(out)
    assert out_np.shape == (batch, output_size)

    # Tight check vs. a pure-JAX model using exactly the folded bf16 params the kernel uses.
    ref_fused = np.asarray(reference_forward_fused(x, fused, output_size))
    np.testing.assert_allclose(out_np, ref_fused, rtol=5e-3, atol=5e-3)

    # Loose check vs. the original f32 (unfolded) module semantics (bf16 matmul error).
    ref_f32 = np.asarray(reference_forward_f32(x, raw))
    np.testing.assert_allclose(out_np, ref_f32, rtol=5e-2, atol=5e-2)

    print("KERNEL_OK")
</pallas_src>

<mosaic_0001>
module attributes {stable_mosaic.version = 11 : i64} {
  func.func @seq_model_kernel(%arg0: i32, %arg1: memref<32x64xbf16, #tpu.memory_space<vmem>>, %arg2: memref<64x128xbf16, #tpu.memory_space<vmem>>, %arg3: memref<1x128xf32, #tpu.memory_space<vmem>>, %arg4: memref<128x64xbf16, #tpu.memory_space<vmem>>, %arg5: memref<1x64xf32, #tpu.memory_space<vmem>>, %arg6: memref<64x32xbf16, #tpu.memory_space<vmem>>, %arg7: memref<1x32xf32, #tpu.memory_space<vmem>>, %arg8: memref<32x16xbf16, #tpu.memory_space<vmem>>, %arg9: memref<1x16xf32, #tpu.memory_space<vmem>>, %arg10: memref<16x8xbf16, #tpu.memory_space<vmem>>, %arg11: memref<1x8xf32, #tpu.memory_space<vmem>>, %arg12: memref<8x128xbf16, #tpu.memory_space<vmem>>, %arg13: memref<1x128xf32, #tpu.memory_space<vmem>>, %arg14: memref<32x128xf32, #tpu.memory_space<vmem>>) attributes {dimension_semantics = [#tpu.dimension_semantics<parallel>], iteration_bounds = array<i64: 2>, scalar_prefetch = 0 : i64, scratch_operands = 0 : i64, tpu.core_type = #tpu.core_type<tc>, window_params = [{transform_indices = @transform_0, window_bounds = array<i64: 32, 64>}, {pipeline_mode = #tpu.pipeline_mode<synchronous>, transform_indices = @transform_1, window_bounds = array<i64: 64, 128>}, {pipeline_mode = #tpu.pipeline_mode<synchronous>, transform_indices = @transform_2, window_bounds = array<i64: 1, 128>}, {pipeline_mode = #tpu.pipeline_mode<synchronous>, transform_indices = @transform_3, window_bounds = array<i64: 128, 64>}, {pipeline_mode = #tpu.pipeline_mode<synchronous>, transform_indices = @transform_4, window_bounds = array<i64: 1, 64>}, {pipeline_mode = #tpu.pipeline_mode<synchronous>, transform_indices = @transform_5, window_bounds = array<i64: 64, 32>}, {pipeline_mode = #tpu.pipeline_mode<synchronous>, transform_indices = @transform_6, window_bounds = array<i64: 1, 32>}, {pipeline_mode = #tpu.pipeline_mode<synchronous>, transform_indices = @transform_7, window_bounds = array<i64: 32, 16>}, {pipeline_mode = #tpu.pipeline_mode<synchronous>, transform_indices = @transform_8, window_bounds = array<i64: 1, 16>}, {pipeline_mode = #tpu.pipeline_mode<synchronous>, transform_indices = @transform_9, window_bounds = array<i64: 16, 8>}, {pipeline_mode = #tpu.pipeline_mode<synchronous>, transform_indices = @transform_10, window_bounds = array<i64: 1, 8>}, {pipeline_mode = #tpu.pipeline_mode<synchronous>, transform_indices = @transform_11, window_bounds = array<i64: 8, 128>}, {pipeline_mode = #tpu.pipeline_mode<synchronous>, transform_indices = @transform_12, window_bounds = array<i64: 1, 128>}, {transform_indices = @transform_13, window_bounds = array<i64: 32, 128>}]} {
    %c0 = arith.constant 0 : index
    %c0_0 = arith.constant 0 : index
    %0 = vector.load %arg1[%c0, %c0_0] : memref<32x64xbf16, #tpu.memory_space<vmem>>, vector<32x64xbf16>
    %c0_1 = arith.constant 0 : index
    %c0_2 = arith.constant 0 : index
    %1 = vector.load %arg2[%c0_1, %c0_2] : memref<64x128xbf16, #tpu.memory_space<vmem>>, vector<64x128xbf16>
    %c0_3 = arith.constant 0 : index
    %c0_4 = arith.constant 0 : index
    %2 = vector.load %arg3[%c0_3, %c0_4] : memref<1x128xf32, #tpu.memory_space<vmem>>, vector<1x128xf32>
    %cst = arith.constant dense<0.000000e+00> : vector<32x128xf32>
    %3 = tpu.matmul %0, %1, %cst {dimension_numbers = #tpu.dot_dimension_numbers<[1], [0], [0], [1], [0, 0, 1, 1], [], []>} : vector<32x64xbf16>, vector<64x128xbf16>, vector<32x128xf32> -> vector<32x128xf32>
    %4 = vector.broadcast %2 : vector<1x128xf32> to vector<32x128xf32>
    %5 = arith.addf %3, %4 : vector<32x128xf32>
    %cst_5 = arith.constant 0.000000e+00 : f32
    %6 = vector.broadcast %cst_5 : f32 to vector<32x128xf32>
    %7 = arith.maximumf %5, %6 : vector<32x128xf32>
    %8 = arith.truncf %7 : vector<32x128xf32> to vector<32x128xbf16>
    %c0_6 = arith.constant 0 : index
    %c0_7 = arith.constant 0 : index
    %9 = vector.load %arg4[%c0_6, %c0_7] : memref<128x64xbf16, #tpu.memory_space<vmem>>, vector<128x64xbf16>
    %c0_8 = arith.constant 0 : index
    %c0_9 = arith.constant 0 : index
    %10 = vector.load %arg5[%c0_8, %c0_9] : memref<1x64xf32, #tpu.memory_space<vmem>>, vector<1x64xf32>
    %cst_10 = arith.constant dense<0.000000e+00> : vector<32x64xf32>
    %11 = tpu.matmul %8, %9, %cst_10 {dimension_numbers = #tpu.dot_dimension_numbers<[1], [0], [0], [1], [0, 0, 1, 1], [], []>} : vector<32x128xbf16>, vector<128x64xbf16>, vector<32x64xf32> -> vector<32x64xf32>
    %12 = vector.broadcast %10 : vector<1x64xf32> to vector<32x64xf32>
    %13 = arith.addf %11, %12 : vector<32x64xf32>
    %cst_11 = arith.constant 0.000000e+00 : f32
    %14 = vector.broadcast %cst_11 : f32 to vector<32x64xf32>
    %15 = arith.maximumf %13, %14 : vector<32x64xf32>
    %16 = arith.truncf %15 : vector<32x64xf32> to vector<32x64xbf16>
    %c0_12 = arith.constant 0 : index
    %c0_13 = arith.constant 0 : index
    %17 = vector.load %arg6[%c0_12, %c0_13] : memref<64x32xbf16, #tpu.memory_space<vmem>>, vector<64x32xbf16>
    %c0_14 = arith.constant 0 : index
    %c0_15 = arith.constant 0 : index
    %18 = vector.load %arg7[%c0_14, %c0_15] : memref<1x32xf32, #tpu.memory_space<vmem>>, vector<1x32xf32>
    %cst_16 = arith.constant dense<0.000000e+00> : vector<32x32xf32>
    %19 = tpu.matmul %16, %17, %cst_16 {dimension_numbers = #tpu.dot_dimension_numbers<[1], [0], [0], [1], [0, 0, 1, 1], [], []>} : vector<32x64xbf16>, vector<64x32xbf16>, vector<32x32xf32> -> vector<32x32xf32>
    %20 = vector.broadcast %18 : vector<1x32xf32> to vector<32x32xf32>
    %21 = arith.addf %19, %20 : vector<32x32xf32>
    %cst_17 = arith.constant 0.000000e+00 : f32
    %22 = vector.broadcast %cst_17 : f32 to vector<32x32xf32>
    %23 = arith.maximumf %21, %22 : vector<32x32xf32>
    %24 = arith.truncf %23 : vector<32x32xf32> to vector<32x32xbf16>
    %c0_18 = arith.constant 0 : index
    %c0_19 = arith.constant 0 : index
    %25 = vector.load %arg8[%c0_18, %c0_19] : memref<32x16xbf16, #tpu.memory_space<vmem>>, vector<32x16xbf16>
    %c0_20 = arith.constant 0 : index
    %c0_21 = arith.constant 0 : index
    %26 = vector.load %arg9[%c0_20, %c0_21] : memref<1x16xf32, #tpu.memory_space<vmem>>, vector<1x16xf32>
    %cst_22 = arith.constant dense<0.000000e+00> : vector<32x16xf32>
    %27 = tpu.matmul %24, %25, %cst_22 {dimension_numbers = #tpu.dot_dimension_numbers<[1], [0], [0], [1], [0, 0, 1, 1], [], []>} : vector<32x32xbf16>, vector<32x16xbf16>, vector<32x16xf32> -> vector<32x16xf32>
    %28 = vector.broadcast %26 : vector<1x16xf32> to vector<32x16xf32>
    %29 = arith.addf %27, %28 : vector<32x16xf32>
    %cst_23 = arith.constant 0.000000e+00 : f32
    %30 = vector.broadcast %cst_23 : f32 to vector<32x16xf32>
    %31 = arith.maximumf %29, %30 : vector<32x16xf32>
    %32 = arith.truncf %31 : vector<32x16xf32> to vector<32x16xbf16>
    %c0_24 = arith.constant 0 : index
    %c0_25 = arith.constant 0 : index
    %33 = vector.load %arg10[%c0_24, %c0_25] : memref<16x8xbf16, #tpu.memory_space<vmem>>, vector<16x8xbf16>
    %c0_26 = arith.constant 0 : index
    %c0_27 = arith.constant 0 : index
    %34 = vector.load %arg11[%c0_26, %c0_27] : memref<1x8xf32, #tpu.memory_space<vmem>>, vector<1x8xf32>
    %cst_28 = arith.constant dense<0.000000e+00> : vector<32x8xf32>
    %35 = tpu.matmul %32, %33, %cst_28 {dimension_numbers = #tpu.dot_dimension_numbers<[1], [0], [0], [1], [0, 0, 1, 1], [], []>} : vector<32x16xbf16>, vector<16x8xbf16>, vector<32x8xf32> -> vector<32x8xf32>
    %36 = vector.broadcast %34 : vector<1x8xf32> to vector<32x8xf32>
    %37 = arith.addf %35, %36 : vector<32x8xf32>
    %cst_29 = arith.constant 0.000000e+00 : f32
    %38 = vector.broadcast %cst_29 : f32 to vector<32x8xf32>
    %39 = arith.maximumf %37, %38 : vector<32x8xf32>
    %40 = arith.truncf %39 : vector<32x8xf32> to vector<32x8xbf16>
    %c0_30 = arith.constant 0 : index
    %c0_31 = arith.constant 0 : index
    %41 = vector.load %arg12[%c0_30, %c0_31] : memref<8x128xbf16, #tpu.memory_space<vmem>>, vector<8x128xbf16>
    %c0_32 = arith.constant 0 : index
    %c0_33 = arith.constant 0 : index
    %42 = vector.load %arg13[%c0_32, %c0_33] : memref<1x128xf32, #tpu.memory_space<vmem>>, vector<1x128xf32>
    %cst_34 = arith.constant dense<0.000000e+00> : vector<32x128xf32>
    %43 = tpu.matmul %40, %41, %cst_34 {dimension_numbers = #tpu.dot_dimension_numbers<[1], [0], [0], [1], [0, 0, 1, 1], [], []>} : vector<32x8xbf16>, vector<8x128xbf16>, vector<32x128xf32> -> vector<32x128xf32>
    %44 = vector.broadcast %42 : vector<1x128xf32> to vector<32x128xf32>
    %45 = arith.addf %43, %44 : vector<32x128xf32>
    %c0_35 = arith.constant 0 : index
    %c0_36 = arith.constant 0 : index
    %46 = vector.load %arg14[%c0_35, %c0_36] : memref<32x128xf32, #tpu.memory_space<vmem>>, vector<32x128xf32>
    tpu.vector_store %arg14[%c0_35, %c0_36], %45 {strides = array<i32>} : memref<32x128xf32, #tpu.memory_space<vmem>>, vector<32x128xf32>,
    return
  }
  func.func @transform_0(%arg0: i32) -> (i32, i32) {
    %c0_i32 = arith.constant 0 : i32
    %c0_i32_0 = arith.constant 0 : i32
    return %arg0, %c0_i32 : i32, i32
  }
  func.func @transform_1(%arg0: i32) -> (i32, i32) {
    %c0_i32 = arith.constant 0 : i32
    %c0_i32_0 = arith.constant 0 : i32
    %c0_i32_1 = arith.constant 0 : i32
    return %c0_i32, %c0_i32_0 : i32, i32
  }
  func.func @transform_2(%arg0: i32) -> (i32, i32) {
    %c0_i32 = arith.constant 0 : i32
    %c0_i32_0 = arith.constant 0 : i32
    %c0_i32_1 = arith.constant 0 : i32
    return %c0_i32, %c0_i32_0 : i32, i32
  }
  func.func @transform_3(%arg0: i32) -> (i32, i32) {
    %c0_i32 = arith.constant 0 : i32
    %c0_i32_0 = arith.constant 0 : i32
    %c0_i32_1 = arith.constant 0 : i32
    return %c0_i32, %c0_i32_0 : i32, i32
  }
  func.func @transform_4(%arg0: i32) -> (i32, i32) {
    %c0_i32 = arith.constant 0 : i32
    %c0_i32_0 = arith.constant 0 : i32
    %c0_i32_1 = arith.constant 0 : i32
    return %c0_i32, %c0_i32_0 : i32, i32
  }
  func.func @transform_5(%arg0: i32) -> (i32, i32) {
    %c0_i32 = arith.constant 0 : i32
    %c0_i32_0 = arith.constant 0 : i32
    %c0_i32_1 = arith.constant 0 : i32
    return %c0_i32, %c0_i32_0 : i32, i32
  }
  func.func @transform_6(%arg0: i32) -> (i32, i32) {
    %c0_i32 = arith.constant 0 : i32
    %c0_i32_0 = arith.constant 0 : i32
    %c0_i32_1 = arith.constant 0 : i32
    return %c0_i32, %c0_i32_0 : i32, i32
  }
  func.func @transform_7(%arg0: i32) -> (i32, i32) {
    %c0_i32 = arith.constant 0 : i32
    %c0_i32_0 = arith.constant 0 : i32
    %c0_i32_1 = arith.constant 0 : i32
    return %c0_i32, %c0_i32_0 : i32, i32
  }
  func.func @transform_8(%arg0: i32) -> (i32, i32) {
    %c0_i32 = arith.constant 0 : i32
    %c0_i32_0 = arith.constant 0 : i32
    %c0_i32_1 = arith.constant 0 : i32
    return %c0_i32, %c0_i32_0 : i32, i32
  }
  func.func @transform_9(%arg0: i32) -> (i32, i32) {
    %c0_i32 = arith.constant 0 : i32
    %c0_i32_0 = arith.constant 0 : i32
    %c0_i32_1 = arith.constant 0 : i32
    return %c0_i32, %c0_i32_0 : i32, i32
  }
  func.func @transform_10(%arg0: i32) -> (i32, i32) {
    %c0_i32 = arith.constant 0 : i32
    %c0_i32_0 = arith.constant 0 : i32
    %c0_i32_1 = arith.constant 0 : i32
    return %c0_i32, %c0_i32_0 : i32, i32
  }
  func.func @transform_11(%arg0: i32) -> (i32, i32) {
    %c0_i32 = arith.constant 0 : i32
    %c0_i32_0 = arith.constant 0 : i32
    %c0_i32_1 = arith.constant 0 : i32
    return %c0_i32, %c0_i32_0 : i32, i32
  }
  func.func @transform_12(%arg0: i32) -> (i32, i32) {
    %c0_i32 = arith.constant 0 : i32
    %c0_i32_0 = arith.constant 0 : i32
    %c0_i32_1 = arith.constant 0 : i32
    return %c0_i32, %c0_i32_0 : i32, i32
  }
  func.func @transform_13(%arg0: i32) -> (i32, i32) {
    %c0_i32 = arith.constant 0 : i32
    %c0_i32_0 = arith.constant 0 : i32
    return %arg0, %c0_i32 : i32, i32
  }
}

module attributes {stable_mosaic.version = 11 : i64} {
  func.func @seq_model_kernel(%arg0: i32, %arg1: memref<32x64xbf16, #tpu.memory_space<vmem>>, %arg2: memref<64x128xbf16, #tpu.memory_space<vmem>>, %arg3: memref<1x128xf32, #tpu.memory_space<vmem>>, %arg4: memref<128x64xbf16, #tpu.memory_space<vmem>>, %arg5: memref<1x64xf32, #tpu.memory_space<vmem>>, %arg6: memref<64x32xbf16, #tpu.memory_space<vmem>>, %arg7: memref<1x32xf32, #tpu.memory_space<vmem>>, %arg8: memref<32x16xbf16, #tpu.memory_space<vmem>>, %arg9: memref<1x16xf32, #tpu.memory_space<vmem>>, %arg10: memref<16x8xbf16, #tpu.memory_space<vmem>>, %arg11: memref<1x8xf32, #tpu.memory_space<vmem>>, %arg12: memref<8x128xbf16, #tpu.memory_space<vmem>>, %arg13: memref<1x128xf32, #tpu.memory_space<vmem>>, %arg14: memref<32x128xf32, #tpu.memory_space<vmem>>) attributes {dimension_semantics = [#tpu.dimension_semantics<parallel>], iteration_bounds = array<i64: 2>, scalar_prefetch = 0 : i64, scratch_operands = 0 : i64, tpu.core_type = #tpu.core_type<tc>, window_params = [{transform_indices = @transform_0, window_bounds = array<i64: 32, 64>}, {pipeline_mode = #tpu.pipeline_mode<synchronous>, transform_indices = @transform_1, window_bounds = array<i64: 64, 128>}, {pipeline_mode = #tpu.pipeline_mode<synchronous>, transform_indices = @transform_2, window_bounds = array<i64: 1, 128>}, {pipeline_mode = #tpu.pipeline_mode<synchronous>, transform_indices = @transform_3, window_bounds = array<i64: 128, 64>}, {pipeline_mode = #tpu.pipeline_mode<synchronous>, transform_indices = @transform_4, window_bounds = array<i64: 1, 64>}, {pipeline_mode = #tpu.pipeline_mode<synchronous>, transform_indices = @transform_5, window_bounds = array<i64: 64, 32>}, {pipeline_mode = #tpu.pipeline_mode<synchronous>, transform_indices = @transform_6, window_bounds = array<i64: 1, 32>}, {pipeline_mode = #tpu.pipeline_mode<synchronous>, transform_indices = @transform_7, window_bounds = array<i64: 32, 16>}, {pipeline_mode = #tpu.pipeline_mode<synchronous>, transform_indices = @transform_8, window_bounds = array<i64: 1, 16>}, {pipeline_mode = #tpu.pipeline_mode<synchronous>, transform_indices = @transform_9, window_bounds = array<i64: 16, 8>}, {pipeline_mode = #tpu.pipeline_mode<synchronous>, transform_indices = @transform_10, window_bounds = array<i64: 1, 8>}, {pipeline_mode = #tpu.pipeline_mode<synchronous>, transform_indices = @transform_11, window_bounds = array<i64: 8, 128>}, {pipeline_mode = #tpu.pipeline_mode<synchronous>, transform_indices = @transform_12, window_bounds = array<i64: 1, 128>}, {transform_indices = @transform_13, window_bounds = array<i64: 32, 128>}]} {
    %c0 = arith.constant 0 : index
    %c0_0 = arith.constant 0 : index
    %0 = vector.load %arg1[%c0, %c0_0] : memref<32x64xbf16, #tpu.memory_space<vmem>>, vector<32x64xbf16>
    %c0_1 = arith.constant 0 : index
    %c0_2 = arith.constant 0 : index
    %1 = vector.load %arg2[%c0_1, %c0_2] : memref<64x128xbf16, #tpu.memory_space<vmem>>, vector<64x128xbf16>
    %c0_3 = arith.constant 0 : index
    %c0_4 = arith.constant 0 : index
    %2 = vector.load %arg3[%c0_3, %c0_4] : memref<1x128xf32, #tpu.memory_space<vmem>>, vector<1x128xf32>
    %cst = arith.constant dense<0.000000e+00> : vector<32x128xf32>
    %3 = tpu.matmul %0, %1, %cst {dimension_numbers = #tpu.dot_dimension_numbers<[1], [0], [0], [1], [0, 0, 1, 1], [], []>} : vector<32x64xbf16>, vector<64x128xbf16>, vector<32x128xf32> -> vector<32x128xf32>
    %4 = vector.broadcast %2 : vector<1x128xf32> to vector<32x128xf32>
    %5 = arith.addf %3, %4 : vector<32x128xf32>
    %cst_5 = arith.constant 0.000000e+00 : f32
    %6 = vector.broadcast %cst_5 : f32 to vector<32x128xf32>
    %7 = arith.maximumf %5, %6 : vector<32x128xf32>
    %8 = arith.truncf %7 : vector<32x128xf32> to vector<32x128xbf16>
    %c0_6 = arith.constant 0 : index
    %c0_7 = arith.constant 0 : index
    %9 = vector.load %arg4[%c0_6, %c0_7] : memref<128x64xbf16, #tpu.memory_space<vmem>>, vector<128x64xbf16>
    %c0_8 = arith.constant 0 : index
    %c0_9 = arith.constant 0 : index
    %10 = vector.load %arg5[%c0_8, %c0_9] : memref<1x64xf32, #tpu.memory_space<vmem>>, vector<1x64xf32>
    %cst_10 = arith.constant dense<0.000000e+00> : vector<32x64xf32>
    %11 = tpu.matmul %8, %9, %cst_10 {dimension_numbers = #tpu.dot_dimension_numbers<[1], [0], [0], [1], [0, 0, 1, 1], [], []>} : vector<32x128xbf16>, vector<128x64xbf16>, vector<32x64xf32> -> vector<32x64xf32>
    %12 = vector.broadcast %10 : vector<1x64xf32> to vector<32x64xf32>
    %13 = arith.addf %11, %12 : vector<32x64xf32>
    %cst_11 = arith.constant 0.000000e+00 : f32
    %14 = vector.broadcast %cst_11 : f32 to vector<32x64xf32>
    %15 = arith.maximumf %13, %14 : vector<32x64xf32>
    %16 = arith.truncf %15 : vector<32x64xf32> to vector<32x64xbf16>
    %c0_12 = arith.constant 0 : index
    %c0_13 = arith.constant 0 : index
    %17 = vector.load %arg6[%c0_12, %c0_13] : memref<64x32xbf16, #tpu.memory_space<vmem>>, vector<64x32xbf16>
    %c0_14 = arith.constant 0 : index
    %c0_15 = arith.constant 0 : index
    %18 = vector.load %arg7[%c0_14, %c0_15] : memref<1x32xf32, #tpu.memory_space<vmem>>, vector<1x32xf32>
    %cst_16 = arith.constant dense<0.000000e+00> : vector<32x32xf32>
    %19 = tpu.matmul %16, %17, %cst_16 {dimension_numbers = #tpu.dot_dimension_numbers<[1], [0], [0], [1], [0, 0, 1, 1], [], []>} : vector<32x64xbf16>, vector<64x32xbf16>, vector<32x32xf32> -> vector<32x32xf32>
    %20 = vector.broadcast %18 : vector<1x32xf32> to vector<32x32xf32>
    %21 = arith.addf %19, %20 : vector<32x32xf32>
    %cst_17 = arith.constant 0.000000e+00 : f32
    %22 = vector.broadcast %cst_17 : f32 to vector<32x32xf32>
    %23 = arith.maximumf %21, %22 : vector<32x32xf32>
    %24 = arith.truncf %23 : vector<32x32xf32> to vector<32x32xbf16>
    %c0_18 = arith.constant 0 : index
    %c0_19 = arith.constant 0 : index
    %25 = vector.load %arg8[%c0_18, %c0_19] : memref<32x16xbf16, #tpu.memory_space<vmem>>, vector<32x16xbf16>
    %c0_20 = arith.constant 0 : index
    %c0_21 = arith.constant 0 : index
    %26 = vector.load %arg9[%c0_20, %c0_21] : memref<1x16xf32, #tpu.memory_space<vmem>>, vector<1x16xf32>
    %cst_22 = arith.constant dense<0.000000e+00> : vector<32x16xf32>
    %27 = tpu.matmul %24, %25, %cst_22 {dimension_numbers = #tpu.dot_dimension_numbers<[1], [0], [0], [1], [0, 0, 1, 1], [], []>} : vector<32x32xbf16>, vector<32x16xbf16>, vector<32x16xf32> -> vector<32x16xf32>
    %28 = vector.broadcast %26 : vector<1x16xf32> to vector<32x16xf32>
    %29 = arith.addf %27, %28 : vector<32x16xf32>
    %cst_23 = arith.constant 0.000000e+00 : f32
    %30 = vector.broadcast %cst_23 : f32 to vector<32x16xf32>
    %31 = arith.maximumf %29, %30 : vector<32x16xf32>
    %32 = arith.truncf %31 : vector<32x16xf32> to vector<32x16xbf16>
    %c0_24 = arith.constant 0 : index
    %c0_25 = arith.constant 0 : index
    %33 = vector.load %arg10[%c0_24, %c0_25] : memref<16x8xbf16, #tpu.memory_space<vmem>>, vector<16x8xbf16>
    %c0_26 = arith.constant 0 : index
    %c0_27 = arith.constant 0 : index
    %34 = vector.load %arg11[%c0_26, %c0_27] : memref<1x8xf32, #tpu.memory_space<vmem>>, vector<1x8xf32>
    %cst_28 = arith.constant dense<0.000000e+00> : vector<32x8xf32>
    %35 = tpu.matmul %32, %33, %cst_28 {dimension_numbers = #tpu.dot_dimension_numbers<[1], [0], [0], [1], [0, 0, 1, 1], [], []>} : vector<32x16xbf16>, vector<16x8xbf16>, vector<32x8xf32> -> vector<32x8xf32>
    %36 = vector.broadcast %34 : vector<1x8xf32> to vector<32x8xf32>
    %37 = arith.addf %35, %36 : vector<32x8xf32>
    %cst_29 = arith.constant 0.000000e+00 : f32
    %38 = vector.broadcast %cst_29 : f32 to vector<32x8xf32>
    %39 = arith.maximumf %37, %38 : vector<32x8xf32>
    %40 = arith.truncf %39 : vector<32x8xf32> to vector<32x8xbf16>
    %c0_30 = arith.constant 0 : index
    %c0_31 = arith.constant 0 : index
    %41 = vector.load %arg12[%c0_30, %c0_31] : memref<8x128xbf16, #tpu.memory_space<vmem>>, vector<8x128xbf16>
    %c0_32 = arith.constant 0 : index
    %c0_33 = arith.constant 0 : index
    %42 = vector.load %arg13[%c0_32, %c0_33] : memref<1x128xf32, #tpu.memory_space<vmem>>, vector<1x128xf32>
    %cst_34 = arith.constant dense<0.000000e+00> : vector<32x128xf32>
    %43 = tpu.matmul %40, %41, %cst_34 {dimension_numbers = #tpu.dot_dimension_numbers<[1], [0], [0], [1], [0, 0, 1, 1], [], []>} : vector<32x8xbf16>, vector<8x128xbf16>, vector<32x128xf32> -> vector<32x128xf32>
    %44 = vector.broadcast %42 : vector<1x128xf32> to vector<32x128xf32>
    %45 = arith.addf %43, %44 : vector<32x128xf32>
    %c0_35 = arith.constant 0 : index
    %c0_36 = arith.constant 0 : index
    %46 = vector.load %arg14[%c0_35, %c0_36] : memref<32x128xf32, #tpu.memory_space<vmem>>, vector<32x128xf32>
    tpu.vector_store %arg14[%c0_35, %c0_36], %45 {strides = array<i32>} : memref<32x128xf32, #tpu.memory_space<vmem>>, vector<32x128xf32>,
    return
  }
  func.func @transform_0(%arg0: i32) -> (i32, i32) {
    %c0_i32 = arith.constant 0 : i32
    %c0_i32_0 = arith.constant 0 : i32
    return %arg0, %c0_i32 : i32, i32
  }
  func.func @transform_1(%arg0: i32) -> (i32, i32) {
    %c0_i32 = arith.constant 0 : i32
    %c0_i32_0 = arith.constant 0 : i32
    %c0_i32_1 = arith.constant 0 : i32
    return %c0_i32, %c0_i32_0 : i32, i32
  }
  func.func @transform_2(%arg0: i32) -> (i32, i32) {
    %c0_i32 = arith.constant 0 : i32
    %c0_i32_0 = arith.constant 0 : i32
    %c0_i32_1 = arith.constant 0 : i32
    return %c0_i32, %c0_i32_0 : i32, i32
  }
  func.func @transform_3(%arg0: i32) -> (i32, i32) {
    %c0_i32 = arith.constant 0 : i32
    %c0_i32_0 = arith.constant 0 : i32
    %c0_i32_1 = arith.constant 0 : i32
    return %c0_i32, %c0_i32_0 : i32, i32
  }
  func.func @transform_4(%arg0: i32) -> (i32, i32) {
    %c0_i32 = arith.constant 0 : i32
    %c0_i32_0 = arith.constant 0 : i32
    %c0_i32_1 = arith.constant 0 : i32
    return %c0_i32, %c0_i32_0 : i32, i32
  }
  func.func @transform_5(%arg0: i32) -> (i32, i32) {
    %c0_i32 = arith.constant 0 : i32
    %c0_i32_0 = arith.constant 0 : i32
    %c0_i32_1 = arith.constant 0 : i32
    return %c0_i32, %c0_i32_0 : i32, i32
  }
  func.func @transform_6(%arg0: i32) -> (i32, i32) {
    %c0_i32 = arith.constant 0 : i32
    %c0_i32_0 = arith.constant 0 : i32
    %c0_i32_1 = arith.constant 0 : i32
    return %c0_i32, %c0_i32_0 : i32, i32
  }
  func.func @transform_7(%arg0: i32) -> (i32, i32) {
    %c0_i32 = arith.constant 0 : i32
    %c0_i32_0 = arith.constant 0 : i32
    %c0_i32_1 = arith.constant 0 : i32
    return %c0_i32, %c0_i32_0 : i32, i32
  }
  func.func @transform_8(%arg0: i32) -> (i32, i32) {
    %c0_i32 = arith.constant 0 : i32
    %c0_i32_0 = arith.constant 0 : i32
    %c0_i32_1 = arith.constant 0 : i32
    return %c0_i32, %c0_i32_0 : i32, i32
  }
  func.func @transform_9(%arg0: i32) -> (i32, i32) {
    %c0_i32 = arith.constant 0 : i32
    %c0_i32_0 = arith.constant 0 : i32
    %c0_i32_1 = arith.constant 0 : i32
    return %c0_i32, %c0_i32_0 : i32, i32
  }
  func.func @transform_10(%arg0: i32) -> (i32, i32) {
    %c0_i32 = arith.constant 0 : i32
    %c0_i32_0 = arith.constant 0 : i32
    %c0_i32_1 = arith.constant 0 : i32
    return %c0_i32, %c0_i32_0 : i32, i32
  }
  func.func @transform_11(%arg0: i32) -> (i32, i32) {
    %c0_i32 = arith.constant 0 : i32
    %c0_i32_0 = arith.constant 0 : i32
    %c0_i32_1 = arith.constant 0 : i32
    return %c0_i32, %c0_i32_0 : i32, i32
  }
  func.func @transform_12(%arg0: i32) -> (i32, i32) {
    %c0_i32 = arith.constant 0 : i32
    %c0_i32_0 = arith.constant 0 : i32
    %c0_i32_1 = arith.constant 0 : i32
    return %c0_i32, %c0_i32_0 : i32, i32
  }
  func.func @transform_13(%arg0: i32) -> (i32, i32) {
    %c0_i32 = arith.constant 0 : i32
    %c0_i32_0 = arith.constant 0 : i32
    return %arg0, %c0_i32 : i32, i32
  }
}

</mosaic_0001>

<bundles_post_ra>
// kernel: tpu_custom_call.1
= control target key start
LH: loop header
LB: loop body
LE: loop exit
PB: predicated region body
PF: predicated region fallthrough
CT: control target
= control target key end

     0   :  { %18 = vsyncpa [#allocation3], 0  ;;  %s1621_s0 = inlined_call_operand.vmem [shape: bf16[64,64], index: 0, kind: input, shape index: {}]   ;;  %s1622_s1 = inlined_call_operand.vmem [shape: bf16[64,128], index: 1, kind: input, shape index: {}]   ;;  %s1623_s2 = inlined_call_operand.vmem [shape: f32[1,128], index: 2, kind: input, shape index: {}]   ;;  %s1624_s3 = inlined_call_operand.vmem [shape: bf16[128,64], index: 3, kind: input, shape index: {}]   ;;  %s1625_s4 = inlined_call_operand.vmem [shape: f32[1,64], index: 4, kind: input, shape index: {}]   ;;  %s1626_s5 = inlined_call_operand.vmem [shape: bf16[64,32], index: 5, kind: input, shape index: {}]   ;;  %s1627_s6 = inlined_call_operand.vmem [shape: f32[1,32], index: 6, kind: input, shape index: {}]   ;;  %s1628_s7 = inlined_call_operand.vmem [shape: bf16[32,16], index: 7, kind: input, shape index: {}]   ;;  %s1629_s8 = inlined_call_operand.vmem [shape: f32[1,16], index: 8, kind: input, shape index: {}]   ;;  %s1630_s9 = inlined_call_operand.vmem [shape: bf16[16,8], index: 9, kind: input, shape index: {}]   ;;  %s1631_s10 = inlined_call_operand.vmem [shape: f32[1,8], index: 10, kind: input, shape index: {}]   ;;  %s1632_s11 = inlined_call_operand.vmem [shape: bf16[8,128], index: 11, kind: input, shape index: {}]   ;;  %s1633_s12 = inlined_call_operand.vmem [shape: f32[1,128], index: 12, kind: input, shape index: {}]   ;;  %s1634_s13 = inlined_call_operand.hbm [shape: f32[64,128], index: 13, kind: output, shape index: {}]  }
   0x1   :  { %20 = vsyncpa [#allocation3 + $0x1], 0  ;;  %s1438_s25 = smov 0   ;;  %s1440_s26 = smov 0  }
   0x2   :  { %s1442_s27 = smov 0   ;;  %s1444_s28 = smov 0  }
   0x3 LB: > { %1639 = sst [smem:[#allocation5_spill]] %s1359_s27  ;;  %s1459_s29 = sadd.s32 4294967295, %s1363_s28   ;;  %s1363_s28 = sphi %s1444_s28, %s1646_s28   ;;  %s1359_s27 = sphi %s1442_s27, %s1648_s27   ;;  %s1355_s26 = sphi %s1440_s26, %s1650_s26   ;;  %s1351_s25 = sphi %s1438_s25, %s1649_s25  }
   0x4   : > { %s1094_s30 = sadd.s32 4294967294, %s1363_s28   ;;  %s1463_s14 = sadd.s32 1, %s1363_s28  }
   0x5   : > { %1640 = sst [smem:[#allocation6_spill]] %s1463_s14  ;;  %s311_s15 = sadd.s32 1, %s1359_s27 }
   0x6   : > { %s308_s16 = ssub.s32 %s1363_s28, %s1463_s14  ;;  %p321_p0 = scmp.ne.s32.totalorder %s1359_s27, %s1355_s26 }
   0x7   : > { %p309_p1 = scmp.eq.s32.totalorder %s308_s16, 0  ;;  %p322_p2 = scmp.eq.s32.totalorder %s1459_s29, 1 }
   0x8   : > { %p327_p3 = scmp.ne.s32.totalorder %s1355_s26, %s1351_s25  ;;  %p328_p4 = scmp.eq.s32.totalorder %s1094_s30, 1 }
   0x9   : > { %s1474_s17 = scalar_select %p309_p1, %s1359_s27, %s311_s15  }
   0xa   : > { %p1476_p5 = por %p322_p2, %p321_p0  ;;  %p1480_p6 = por %p328_p4, %p327_p3 }
   0xb   : > { %1641 = sst [smem:[#allocation7_spill]] %s1474_s17  ;;  %p1097_p7 = scmp.ge.s32.totalorder %s1363_s28, 1 }
   0xc   : > { %s1643_s19 = scalar_select %p1480_p6, 1, 0 }
   0xd   : > { %p391_p8 = scmp.lt.s32.totalorder %s1363_s28, 3 }
   0xe   : > { %1644 = sst [smem:[#allocation8_spill]] %s1643_s19 }
   0xf   : > { %p392_p9 = pnand %p1097_p7, %p391_p8 }
  0x10   : > { %s1099_s22 = sshll.u32 (!%p392_p9), %s1459_s29, 2  ;;  %s432_s27 = sand.u32 (!%p392_p9), 1, %s1355_s26  }
  0x11   : > { %395 = sbr.rel (%p392_p9) target bundleno = 1284 (0x504), region = 72  ;;  %p436_p10 = scmp.lt.s32.totalorder (!%p392_p9), %s1099_s22, 7 }
  0x12   : > { %s1098_s15 = sshll.u32 (!%p392_p9), %s432_s27, 5  ;;  %s1143_s21 = sshll.u32 (!%p392_p9), %s1459_s29, 9 }
  0x13   : > { %s434_s16 = scalar_lea.vmem (!%p392_p9), [#allocation2], %s1098_s15  ;;  %s1581_s17 = scalar_lea.sflag (!%p392_p9), [#allocation3], %s432_s27 }
  0x16   : > { %v1282_v0 = vld [vmem:[%s1622_s1 + $0x18] sm:$0xff]   ;;  %v1283_v1 = vld [vmem:[%s1622_s1 + $0x10] sm:$0xff]   ;;  %v1284_v2 = vld [vmem:[%s1622_s1 + $0x8] sm:$0xff]   ;;  %s1652_s22 = smov (!%p436_p10, %s1099_s22), 7  ;;  %vm496_vm0 = vcmask 523264   ;;  %vm807_vm1 = vcmask 261120  }
  0x17   : > { %1176 = vmatprep.subr.bf16.mxu0 %v1282_v0  ;;  %v1288_v3 = vld [vmem:[%s1624_s3 + $0x38] sm:$0xff]   ;;  %s1100_s20 = sshll.u32 %s1652_s22, 2  ;;  %v1289_v4 = vld [vmem:[%s1624_s3 + $0x30] sm:$0xff]   ;;  %v1285_v5 = vld [vmem:[%s1622_s1] sm:$0xff]   ;;  %vm884_vm2 = vcmask 130048   ;;  %vm961_vm3 = vcmask 1043456  }
  0x18   : > { %1177 = vmatpush3.bf16.msra.mxu0 %v1282_v0  ;;  %s439_s30 = scalar_lea.vmem %s1621_s0, %s1100_s20  ;;  %1188 = vmatprep.subr.bf16.mxu1 %v1288_v3  ;;  %v1290_v7 = vld [vmem:[%s1624_s3 + $0x28] sm:$0xff]   ;;  %v1291_v8 = vld [vmem:[%s1624_s3 + $0x20] sm:$0xff]   ;;  %v1292_v10 = vld [vmem:[%s1624_s3 + $0x18] sm:$0xff]   ;;  %vm954_vm4 = vcmask 64512   ;;  %s1032_s20 = sshll.u32 %s434_s16, 4  ;;  %s1574_s20 = int_to_ptr.vmem [resolvable:$true] %s1032_s20 }
  0x19   : > { %1178 = vmatprep.subr.bf16.mxu0 %v1283_v1  ;;  %v1286_v6 = vld [vmem:[%s439_s30] sm:$0xff]   ;;  %1189 = vmatpush3.bf16.msra.mxu1 %v1288_v3  ;;  %v1287_v9 = vld [vmem:[%s439_s30 + $0x8] sm:$0xff]   ;;  %v1293_v11 = vld [vmem:[%s1624_s3 + $0x10] sm:$0xff]   ;;  %s1579_s30 = scalar_lea.hbm %s1634_s13, %s1143_s21  ;;  %s1303_s29 = scalar_lea.vmem %s1574_s20, 512 }
  0x1a   : > { %1190 = vmatprep.subr.bf16.mxu1 %v1289_v4  ;;  %1184 = vmatprep.mubr.msk.bf16.mxu0 %vm496_vm0, %v1286_v6  ;;  %v1294_v12 = vld [vmem:[%s1624_s3 + $0x8] sm:$0xff]   ;;  %v1295_v13 = vld [vmem:[%s1624_s3] sm:$0xff]   ;;  %v1296_v14 = vld [vmem:[%s1626_s5 + $0x18] sm:$0xff]   ;;  %p1304_p11 = scmp.ne.s32.totalorder %s1574_s20, %s1303_s29  ;;  %s1365_s22 = smov [#allocation2]  }
  0x1b   : > { %v1101_v17 = vld [vmem:[%s1623_s2] ss:$0 sm:$0xff]  ;;  %v1297_v30 = vld [vmem:[%s1626_s5 + $0x10] sm:$0xff]   ;;  %v1298_v31 = vld [vmem:[%s1626_s5 + $0x8] sm:$0xff]   ;;  %s1307_s15 = sshll.u32 %s1365_s22, 4  ;;  %s1308_s15 = int_to_ptr.vmem [resolvable:$false] %s1307_s15 }
  0x1c   : > { %1179 = vmatpush3.bf16.msra.mxu0 %v1283_v1  ;;  %v1299_v32 = vld [vmem:[%s1626_s5] sm:$0xff]   ;;  %v1300_v48 = vld [vmem:[%s1628_s7 + $0x8] sm:$0xff]   ;;  %p1305_p12 = pnand %p1304_p11, %p1476_p5  ;;  %s1309_s14 = scalar_lea.vmem %s1308_s15, 1024 }
  0x1d   : > { %1180 = vmatprep.subr.bf16.mxu0 %v1284_v2  ;;  %1191 = vmatpush3.bf16.msra.mxu1 %v1289_v4  ;;  %v1110_v35 = vld [vmem:[%s1625_s4] ss:$0 sm:$0xff]  ;;  %p1310_p0 = scmp.lt.s32.totalorder %s1574_s20, %s1308_s15  ;;  %p1311_p1 = scmp.lt.s32.totalorder %s1309_s14, %s1303_s29 }
  0x1e   : > { %1192 = vmatprep.subr.bf16.mxu1 %v1290_v7  ;;  %v1301_v49 = vld [vmem:[%s1628_s7] sm:$0xff]   ;;  %p1306_p13 = pneg %p1305_p12 }
  0x1f   : > { %v1119_v52 = vld [vmem:[%s1627_s6] ss:$0 sm:$0xff]  ;;  %p1312_p2 = por %p1311_p1, %p1310_p0 }
  0x20   : > { %1181 = vmatpush3.bf16.msra.mxu0 %v1284_v2  ;;  %v1302_v1 = vld [vmem:[%s1630_s9] sm:$0xff]  }
  0x21   : > { %1182 = vmatprep.subr.bf16.mxu0 %v1285_v5  ;;  %1193 = vmatpush3.bf16.msra.mxu1 %v1290_v7  ;;  %v1126_v4 = vld [vmem:[%s1629_s8] ss:$0 sm:$0xff]  ;;  %p1313_p3 = pnand %p1312_p2, %p1306_p13 }
  0x22   : > { %1194 = vmatprep.subr.bf16.mxu1 %v1291_v8 }
  0x24   : > { %1183 = vmatpush3.bf16.msra.mxu0 %v1285_v5 }
  0x25   : > { %1195 = vmatpush3.bf16.msra.mxu1 %v1291_v8  ;;  %1208 = vmatprep.subr.bf16.mxu0 %v1296_v14 }
  0x26   : > { %1196 = vmatprep.subr.bf16.mxu1 %v1292_v10 }
  0x27   : > { %1185 = vmatmul.mubr.msk.bf16.vlgmr.msra.gmra.mxu0 %vm496_vm0, %v1287_v9 }
  0x28   : > { %1209 = vmatpush3.bf16.msra.mxu0 %v1296_v14 }
  0x29   : > { %1197 = vmatpush3.bf16.msra.mxu1 %v1292_v10  ;;  %1210 = vmatprep.subr.bf16.mxu0 %v1297_v30 }
  0x2a   : > { %1198 = vmatprep.subr.bf16.mxu1 %v1293_v11 }
  0x2c   : > { %1211 = vmatpush3.bf16.msra.mxu0 %v1297_v30 }
  0x2d   : > { %1199 = vmatpush3.bf16.msra.mxu1 %v1293_v11  ;;  %1212 = vmatprep.subr.bf16.mxu0 %v1298_v31 }
  0x2e   : > { %1200 = vmatprep.subr.bf16.mxu1 %v1294_v12 }
  0x30   : > { %1213 = vmatpush3.bf16.msra.mxu0 %v1298_v31 }
  0x31   : > { %1201 = vmatpush3.bf16.msra.mxu1 %v1294_v12  ;;  %1214 = vmatprep.subr.bf16.mxu0 %v1299_v32 }
  0x32   : > { %1202 = vmatprep.subr.bf16.mxu1 %v1295_v13 }
  0x34   : > { %1215 = vmatpush3.bf16.msra.mxu0 %v1299_v32 }
  0x35   : > { %1203 = vmatpush3.bf16.msra.mxu1 %v1295_v13  ;;  %1220 = vmatprep.subr.bf16.mxu0 %v1300_v48 }
  0x36   : > { %1228 = vmatprep.subr.bf16.mxu1 %v1302_v1 }
  0xe7   : > { %v1186_v15 = vpop.f32.mrf.mxu0 }
  0xe8   : > { %v546_v21 = vadd.f32 %v1186_v15, %v1101_v17 }
  0xe9   : > { %v537_v16 = vpop.f32.mrf.mxu0 }
  0xea   : > { %v538_v19 = vadd.f32 %v1101_v17, %v537_v16  ;;  %v554_v27 = vmax.f32 %v546_v21, 0.0  ;;  %v1131_v21 = vld [vmem:[%s1631_s10] ss:$0 sm:$0xff] }
  0xeb   : > { %v1187_v18 = vpop.f32.mrf.mxu0 }
  0xec   : > { %v549_v20 = vadd.f32 %v1187_v18, %v1101_v17  ;;  %v552_v25 = vmax.f32 %v538_v19, 0.0 }
  0xed   : > { %v540_v22 = vpop.f32.mrf.mxu0 }
  0xee   : > { %v541_v23 = vadd.f32 %v1101_v17, %v540_v22  ;;  %v555_v24 = vmax.f32 %v549_v20, 0.0  ;;  %v946_v17 = vld [vmem:[%s1632_s11] sm:$0xf] }
  0xef   : > { %v963_v18 = vsel %vm961_vm3, %v946_v17, 0 }
  0xf0   : > { %v553_v26 = vmax.f32 %v541_v23, 0.0  ;;  %v557_v29 = vpack.c.bf16 %v555_v24, %v554_v27 }
  0xf2   : > { %v556_v28 = vpack.c.bf16 %v553_v26, %v552_v25 }
  0xf4   : > { %1204 = vmatprep.mubr.bf16.mxu1 %v556_v28 }
  0xf5   : > { %1205 = vmatmul.mubr.bf16.vlgmr.msra.gmra.mxu1 %v557_v29 }
  0xf6   : > { %1229 = vmatpush3.bf16.msra.mxu1 %v1302_v1 }
 0x1b5   : > { %v1206_v33 = vpop.f32.mrf.mxu1 }
 0x1b6   : > { %v672_v39 = vadd.f32 %v1206_v33, %v1110_v35 }
 0x1b7   : > { %v663_v34 = vpop.f32.mrf.mxu1 }
 0x1b8   : > { %v664_v37 = vadd.f32 %v1110_v35, %v663_v34  ;;  %v680_v45 = vmax.f32 %v672_v39, 0.0  ;;  %v1135_v34 = vld [vmem:[%s1633_s12] ss:$0 sm:$0xff] }
 0x1b9   : > { %v1207_v36 = vpop.f32.mrf.mxu1 }
 0x1ba   : > { %v675_v38 = vadd.f32 %v1207_v36, %v1110_v35  ;;  %v678_v43 = vmax.f32 %v664_v37, 0.0 }
 0x1bb   : > { %v666_v40 = vpop.f32.mrf.mxu1 }
 0x1bc   : > { %v667_v41 = vadd.f32 %v1110_v35, %v666_v40  ;;  %v681_v42 = vmax.f32 %v675_v38, 0.0 }
 0x1be   : > { %v679_v44 = vmax.f32 %v667_v41, 0.0  ;;  %v683_v47 = vpack.c.bf16 %v681_v42, %v680_v45 }
 0x1c0   : > { %v682_v46 = vpack.c.bf16 %v679_v44, %v678_v43 }
 0x1c2   : > { %1216 = vmatprep.mubr.msk.bf16.mxu0 %vm496_vm0, %v682_v46 }
 0x1c3   : > { %1217 = vmatmul.mubr.msk.bf16.vlgmr.msra.gmra.mxu0 %vm496_vm0, %v683_v47 }
 0x1c4   : > { %1221 = vmatpush3.bf16.msra.mxu0 %v1300_v48 }
 0x1c5   : > { %1222 = vmatprep.subr.bf16.mxu0 %v1301_v49 }
 0x1c8   : > { %1223 = vmatpush3.bf16.msra.mxu0 %v1301_v49 }
 0x1c9   : > { %1240 = vmatprep.subr.msk.bf16.mxu0 %vm961_vm3, %v946_v17 }
 0x283   : > { %v1218_v50 = vpop.f32.mrf.mxu0 }
 0x284   : > { %v772_v56 = vadd.f32 %v1218_v50, %v1119_v52 }
 0x285   : > { %v763_v51 = vpop.f32.mrf.mxu0 }
 0x286   : > { %v764_v54 = vadd.f32 %v1119_v52, %v763_v51  ;;  %v780_v62 = vmax.f32 %v772_v56, 0.0 }
 0x287   : > { %v1219_v53 = vpop.f32.mrf.mxu0 }
 0x288   : > { %v775_v55 = vadd.f32 %v1219_v53, %v1119_v52  ;;  %v778_v60 = vmax.f32 %v764_v54, 0.0 }
 0x289   : > { %v766_v57 = vpop.f32.mrf.mxu0 }
 0x28a   : > { %v767_v58 = vadd.f32 %v1119_v52, %v766_v57  ;;  %v781_v59 = vmax.f32 %v775_v55, 0.0 }
 0x28c   : > { %v779_v61 = vmax.f32 %v767_v58, 0.0  ;;  %v783_v0 = vpack.c.bf16 %v781_v59, %v780_v62 }
 0x28e   : > { %v782_v63 = vpack.c.bf16 %v779_v61, %v778_v60 }
 0x290   : > { %1224 = vmatprep.mubr.msk.bf16.mxu0 %vm807_vm1, %v782_v63 }
 0x291   : > { %1225 = vmatmul.mubr.msk.bf16.vlgmr.msra.gmra.mxu0 %vm807_vm1, %v783_v0 }
 0x292   : > { %1235 = vmatpush3.bf16.msra.mxu0 %v963_v18 }
 0x351   : > { %v1226_v2 = vpop.f32.mrf.mxu0 }
 0x352   : > { %v857_v8 = vadd.f32 %v1226_v2, %v1126_v4 }
 0x353   : > { %v848_v3 = vpop.f32.mrf.mxu0 }
 0x354   : > { %v849_v6 = vadd.f32 %v1126_v4, %v848_v3  ;;  %v865_v14 = vmax.f32 %v857_v8, 0.0 }
 0x355   : > { %v1227_v5 = vpop.f32.mrf.mxu0 }
 0x356   : > { %v860_v7 = vadd.f32 %v1227_v5, %v1126_v4  ;;  %v863_v12 = vmax.f32 %v849_v6, 0.0 }
 0x357   : > { %v851_v9 = vpop.f32.mrf.mxu0 }
 0x358   : > { %v852_v10 = vadd.f32 %v1126_v4, %v851_v9  ;;  %v866_v11 = vmax.f32 %v860_v7, 0.0 }
 0x35a   : > { %v864_v13 = vmax.f32 %v852_v10, 0.0  ;;  %v868_v16 = vpack.c.bf16 %v866_v11, %v865_v14 }
 0x35c   : > { %v867_v15 = vpack.c.bf16 %v864_v13, %v863_v12 }
 0x35e   : > { %1230 = vmatprep.mubr.msk.bf16.mxu1 %vm884_vm2, %v867_v15 }
 0x35f   : > { %1231 = vmatmul.mubr.msk.bf16.vlgmr.msra.gmra.mxu1 %vm884_vm2, %v868_v16 }
 0x41f   : > { %v1232_v19 = vpop.f32.mrf.mxu1 }
 0x420   : > { %v934_v25 = vadd.f32 %v1232_v19, %v1131_v21 }
 0x421   : > { %v925_v20 = vpop.f32.mrf.mxu1 }
 0x422   : > { %v926_v23 = vadd.f32 %v1131_v21, %v925_v20  ;;  %v942_v31 = vmax.f32 %v934_v25, 0.0 }
 0x423   : > { %v1233_v22 = vpop.f32.mrf.mxu1 }
 0x424   : > { %v937_v24 = vadd.f32 %v1233_v22, %v1131_v21  ;;  %v940_v29 = vmax.f32 %v926_v23, 0.0 }
 0x425   : > { %v928_v26 = vpop.f32.mrf.mxu1 }
 0x426   : > { %v929_v27 = vadd.f32 %v1131_v21, %v928_v26  ;;  %v943_v28 = vmax.f32 %v937_v24, 0.0 }
 0x428   : > { %v941_v30 = vmax.f32 %v929_v27, 0.0  ;;  %v945_v33 = vpack.c.bf16 %v943_v28, %v942_v31 }
 0x42a   : > { %v944_v32 = vpack.c.bf16 %v941_v30, %v940_v29 }
 0x42c   : > { %1236 = vmatprep.mubr.msk.bf16.mxu0 %vm954_vm4, %v944_v32 }
 0x42d   : > { %1237 = vmatmul.mubr.msk.bf16.vlgmr.msra.gmra.mxu0 %vm954_vm4, %v945_v33 }
 0x4ed   : > { %v1238_v35 = vpop.f32.mrf.mxu0 }
 0x4ee   : > { %v1008_v36 = vadd.f32 %v1238_v35, %v1135_v34 }
 0x4ef   : > { %v999_v37 = vpop.f32.mrf.mxu0 }
 0x4f0   : > { %1016 = vst [vmem:[%s434_s16 + $0x10] sm:$0xff] %v1008_v36  ;;  %v1000_v38 = vadd.f32 %v1135_v34, %v999_v37 }
 0x4f1   : > { %v1239_v39 = vpop.f32.mrf.mxu0 }
 0x4f2   : > { %1014 = vst [vmem:[%s434_s16] sm:$0xff] %v1000_v38  ;;  %v1011_v40 = vadd.f32 %v1239_v39, %v1135_v34 }
 0x4f3   : > { %v1002_v41 = vpop.f32.mrf.mxu0 }
 0x4f4   : > { %1017 = vst [vmem:[%s434_s16 + $0x18] sm:$0xff] %v1011_v40  ;;  %v1003_v42 = vadd.f32 %v1135_v34, %v1002_v41 }
 0x4f6   : > { %1015 = vst [vmem:[%s434_s16 + $0x8] sm:$0xff] %v1003_v42 }
 0x4f7   : > { %1316 = shalt.err (!%p1313_p3)
}
 0x4f8   : > { %s1317_s27 = scalar_lea.hbm %s1579_s30, 512  ;;  %s1321_s21 = scalar_lea.hbm %s1634_s13, 1024 }
 0x4f9   : > { %p1318_p4 = scmp.ne.s32.totalorder %s1579_s30, %s1317_s27  ;;  %p1322_p9 = scmp.lt.s32.totalorder %s1579_s30, %s1634_s13 }
 0x4fa   : > { %p1323_p10 = scmp.lt.s32.totalorder %s1321_s21, %s1317_s27 }
 0x4fb   : > { %p1319_p7 = pnand %p1318_p4, %p1476_p5 }
 0x4fc   : > { %p1324_p11 = por %p1323_p10, %p1322_p9 }
 0x4fd   : > { %p1320_p8 = pneg %p1319_p7 }
 0x4ff   : > { %p1325_p12 = pnand %p1324_p11, %p1320_p8 }
 0x501   : > { %1328 = shalt.err (!%p1325_p12)
}
 0x502   : > { %s1366_s29 = smov 128   ;;  %s1367_s22 = smov 8  }
 0x503   : > { %1241 = dma.vmem_to_hbm [thread:$0]  (%p1476_p5), %s1574_s20, 512, %s1579_s30, %s1581_s17, %s1366_s29, %s1366_s29, %s1367_s22  }
 0x504 PF: > { %p1247_p13 = scmp.ge.s32.totalorder %s1363_s28, 2  ;;  %s1047_s14 = sand.u32 1, %s1351_s25  }
 0x505   : > { %s1048_s27 = scalar_lea.sflag [#allocation3], %s1047_s14 }
 0x506   : > { %p1244_p0 = pnand %p1247_p13, %p1480_p6 }
 0x508   : > { %p1245_p1 = pneg %p1244_p0 }
 0x50a   : > { %1346 = dma.done.wait (%p1245_p1), %s1048_s27, 512  }
 0x50b   : > { %1348 = vsyncadd (%p1245_p1), %s1048_s27, 4294966784  ;;  %s1646_s28 = sld [smem:[#allocation6_spill]]  ;;  %s1649_s25 = smov %s1355_s26 }
 0x50c   : > { %s1647_s19 = sld [smem:[#allocation5_spill]] }
 0x50d   : > { %s1648_s27 = sld [smem:[#allocation7_spill]] }
 0x511   : > { %p23_p2 = scmp.ge.s32.totalorder %s1646_s28, 4  }
 0x512   : > { %s1650_s26 = smov %s1647_s19 }
 0x513   :  { %25 = sbr.rel (!%p23_p2) target bundleno = 3 (0x3), region = 107 }
 0x518   :  { %1053 = vsyncpa [#allocation3], 1 }
 0x519   :  { %1055 = vsyncpa [#allocation3 + $0x1], 1 }

// kernel: tpu_custom_call.1
= control target key start
LH: loop header
LB: loop body
LE: loop exit
PB: predicated region body
PF: predicated region fallthrough
CT: control target
= control target key end

     0   :  { %18 = vsyncpa [#allocation3], 0  ;;  %s1621_s0 = inlined_call_operand.vmem [shape: bf16[64,64], index: 0, kind: input, shape index: {}]   ;;  %s1622_s1 = inlined_call_operand.vmem [shape: bf16[64,128], index: 1, kind: input, shape index: {}]   ;;  %s1623_s2 = inlined_call_operand.vmem [shape: f32[1,128], index: 2, kind: input, shape index: {}]   ;;  %s1624_s3 = inlined_call_operand.vmem [shape: bf16[128,64], index: 3, kind: input, shape index: {}]   ;;  %s1625_s4 = inlined_call_operand.vmem [shape: f32[1,64], index: 4, kind: input, shape index: {}]   ;;  %s1626_s5 = inlined_call_operand.vmem [shape: bf16[64,32], index: 5, kind: input, shape index: {}]   ;;  %s1627_s6 = inlined_call_operand.vmem [shape: f32[1,32], index: 6, kind: input, shape index: {}]   ;;  %s1628_s7 = inlined_call_operand.vmem [shape: bf16[32,16], index: 7, kind: input, shape index: {}]   ;;  %s1629_s8 = inlined_call_operand.vmem [shape: f32[1,16], index: 8, kind: input, shape index: {}]   ;;  %s1630_s9 = inlined_call_operand.vmem [shape: bf16[16,8], index: 9, kind: input, shape index: {}]   ;;  %s1631_s10 = inlined_call_operand.vmem [shape: f32[1,8], index: 10, kind: input, shape index: {}]   ;;  %s1632_s11 = inlined_call_operand.vmem [shape: bf16[8,128], index: 11, kind: input, shape index: {}]   ;;  %s1633_s12 = inlined_call_operand.vmem [shape: f32[1,128], index: 12, kind: input, shape index: {}]   ;;  %s1634_s13 = inlined_call_operand.hbm [shape: f32[64,128], index: 13, kind: output, shape index: {}]  }
   0x1   :  { %20 = vsyncpa [#allocation3 + $0x1], 0  ;;  %s1438_s25 = smov 0   ;;  %s1440_s26 = smov 0  }
   0x2   :  { %s1442_s27 = smov 0   ;;  %s1444_s28 = smov 0  }
   0x3 LB: > { %1639 = sst [smem:[#allocation5_spill]] %s1359_s27  ;;  %s1459_s29 = sadd.s32 4294967295, %s1363_s28   ;;  %s1363_s28 = sphi %s1444_s28, %s1646_s28   ;;  %s1359_s27 = sphi %s1442_s27, %s1648_s27   ;;  %s1355_s26 = sphi %s1440_s26, %s1650_s26   ;;  %s1351_s25 = sphi %s1438_s25, %s1649_s25  }
   0x4   : > { %s1094_s30 = sadd.s32 4294967294, %s1363_s28   ;;  %s1463_s14 = sadd.s32 1, %s1363_s28  }
   0x5   : > { %1640 = sst [smem:[#allocation6_spill]] %s1463_s14  ;;  %s311_s15 = sadd.s32 1, %s1359_s27 }
   0x6   : > { %s308_s16 = ssub.s32 %s1363_s28, %s1463_s14  ;;  %p321_p0 = scmp.ne.s32.totalorder %s1359_s27, %s1355_s26 }
   0x7   : > { %p309_p1 = scmp.eq.s32.totalorder %s308_s16, 0  ;;  %p322_p2 = scmp.eq.s32.totalorder %s1459_s29, 1 }
   0x8   : > { %p327_p3 = scmp.ne.s32.totalorder %s1355_s26, %s1351_s25  ;;  %p328_p4 = scmp.eq.s32.totalorder %s1094_s30, 1 }
   0x9   : > { %s1474_s17 = scalar_select %p309_p1, %s1359_s27, %s311_s15  }
   0xa   : > { %p1476_p5 = por %p322_p2, %p321_p0  ;;  %p1480_p6 = por %p328_p4, %p327_p3 }
   0xb   : > { %1641 = sst [smem:[#allocation7_spill]] %s1474_s17  ;;  %p1097_p7 = scmp.ge.s32.totalorder %s1363_s28, 1 }
   0xc   : > { %s1643_s19 = scalar_select %p1480_p6, 1, 0 }
   0xd   : > { %p391_p8 = scmp.lt.s32.totalorder %s1363_s28, 3 }
   0xe   : > { %1644 = sst [smem:[#allocation8_spill]] %s1643_s19 }
   0xf   : > { %p392_p9 = pnand %p1097_p7, %p391_p8 }
  0x10   : > { %s1099_s22 = sshll.u32 (!%p392_p9), %s1459_s29, 2  ;;  %s432_s27 = sand.u32 (!%p392_p9), 1, %s1355_s26  }
  0x11   : > { %395 = sbr.rel (%p392_p9) target bundleno = 1284 (0x504), region = 72  ;;  %p436_p10 = scmp.lt.s32.totalorder (!%p392_p9), %s1099_s22, 7 }
  0x12   : > { %s1098_s15 = sshll.u32 (!%p392_p9), %s432_s27, 5  ;;  %s1143_s21 = sshll.u32 (!%p392_p9), %s1459_s29, 9 }
  0x13   : > { %s434_s16 = scalar_lea.vmem (!%p392_p9), [#allocation2], %s1098_s15  ;;  %s1581_s17 = scalar_lea.sflag (!%p392_p9), [#allocation3], %s432_s27 }
  0x16   : > { %v1282_v0 = vld [vmem:[%s1622_s1 + $0x18] sm:$0xff]   ;;  %v1283_v1 = vld [vmem:[%s1622_s1 + $0x10] sm:$0xff]   ;;  %v1284_v2 = vld [vmem:[%s1622_s1 + $0x8] sm:$0xff]   ;;  %s1652_s22 = smov (!%p436_p10, %s1099_s22), 7  ;;  %vm496_vm0 = vcmask 523264   ;;  %vm807_vm1 = vcmask 261120  }
  0x17   : > { %1176 = vmatprep.subr.bf16.mxu0 %v1282_v0  ;;  %v1288_v3 = vld [vmem:[%s1624_s3 + $0x38] sm:$0xff]   ;;  %s1100_s20 = sshll.u32 %s1652_s22, 2  ;;  %v1289_v4 = vld [vmem:[%s1624_s3 + $0x30] sm:$0xff]   ;;  %v1285_v5 = vld [vmem:[%s1622_s1] sm:$0xff]   ;;  %vm884_vm2 = vcmask 130048   ;;  %vm961_vm3 = vcmask 1043456  }
  0x18   : > { %1177 = vmatpush3.bf16.msra.mxu0 %v1282_v0  ;;  %s439_s30 = scalar_lea.vmem %s1621_s0, %s1100_s20  ;;  %1188 = vmatprep.subr.bf16.mxu1 %v1288_v3  ;;  %v1290_v7 = vld [vmem:[%s1624_s3 + $0x28] sm:$0xff]   ;;  %v1291_v8 = vld [vmem:[%s1624_s3 + $0x20] sm:$0xff]   ;;  %v1292_v10 = vld [vmem:[%s1624_s3 + $0x18] sm:$0xff]   ;;  %vm954_vm4 = vcmask 64512   ;;  %s1032_s20 = sshll.u32 %s434_s16, 4  ;;  %s1574_s20 = int_to_ptr.vmem [resolvable:$true] %s1032_s20 }
  0x19   : > { %1178 = vmatprep.subr.bf16.mxu0 %v1283_v1  ;;  %v1286_v6 = vld [vmem:[%s439_s30] sm:$0xff]   ;;  %1189 = vmatpush3.bf16.msra.mxu1 %v1288_v3  ;;  %v1287_v9 = vld [vmem:[%s439_s30 + $0x8] sm:$0xff]   ;;  %v1293_v11 = vld [vmem:[%s1624_s3 + $0x10] sm:$0xff]   ;;  %s1579_s30 = scalar_lea.hbm %s1634_s13, %s1143_s21  ;;  %s1303_s29 = scalar_lea.vmem %s1574_s20, 512 }
  0x1a   : > { %1190 = vmatprep.subr.bf16.mxu1 %v1289_v4  ;;  %1184 = vmatprep.mubr.msk.bf16.mxu0 %vm496_vm0, %v1286_v6  ;;  %v1294_v12 = vld [vmem:[%s1624_s3 + $0x8] sm:$0xff]   ;;  %v1295_v13 = vld [vmem:[%s1624_s3] sm:$0xff]   ;;  %v1296_v14 = vld [vmem:[%s1626_s5 + $0x18] sm:$0xff]   ;;  %p1304_p11 = scmp.ne.s32.totalorder %s1574_s20, %s1303_s29  ;;  %s1365_s22 = smov [#allocation2]  }
  0x1b   : > { %v1101_v17 = vld [vmem:[%s1623_s2] ss:$0 sm:$0xff]  ;;  %v1297_v30 = vld [vmem:[%s1626_s5 + $0x10] sm:$0xff]   ;;  %v1298_v31 = vld [vmem:[%s1626_s5 + $0x8] sm:$0xff]   ;;  %s1307_s15 = sshll.u32 %s1365_s22, 4  ;;  %s1308_s15 = int_to_ptr.vmem [resolvable:$false] %s1307_s15 }
  0x1c   : > { %1179 = vmatpush3.bf16.msra.mxu0 %v1283_v1  ;;  %v1299_v32 = vld [vmem:[%s1626_s5] sm:$0xff]   ;;  %v1300_v48 = vld [vmem:[%s1628_s7 + $0x8] sm:$0xff]   ;;  %p1305_p12 = pnand %p1304_p11, %p1476_p5  ;;  %s1309_s14 = scalar_lea.vmem %s1308_s15, 1024 }
  0x1d   : > { %1180 = vmatprep.subr.bf16.mxu0 %v1284_v2  ;;  %1191 = vmatpush3.bf16.msra.mxu1 %v1289_v4  ;;  %v1110_v35 = vld [vmem:[%s1625_s4] ss:$0 sm:$0xff]  ;;  %p1310_p0 = scmp.lt.s32.totalorder %s1574_s20, %s1308_s15  ;;  %p1311_p1 = scmp.lt.s32.totalorder %s1309_s14, %s1303_s29 }
  0x1e   : > { %1192 = vmatprep.subr.bf16.mxu1 %v1290_v7  ;;  %v1301_v49 = vld [vmem:[%s1628_s7] sm:$0xff]   ;;  %p1306_p13 = pneg %p1305_p12 }
  0x1f   : > { %v1119_v52 = vld [vmem:[%s1627_s6] ss:$0 sm:$0xff]  ;;  %p1312_p2 = por %p1311_p1, %p1310_p0 }
  0x20   : > { %1181 = vmatpush3.bf16.msra.mxu0 %v1284_v2  ;;  %v1302_v1 = vld [vmem:[%s1630_s9] sm:$0xff]  }
  0x21   : > { %1182 = vmatprep.subr.bf16.mxu0 %v1285_v5  ;;  %1193 = vmatpush3.bf16.msra.mxu1 %v1290_v7  ;;  %v1126_v4 = vld [vmem:[%s1629_s8] ss:$0 sm:$0xff]  ;;  %p1313_p3 = pnand %p1312_p2, %p1306_p13 }
  0x22   : > { %1194 = vmatprep.subr.bf16.mxu1 %v1291_v8 }
  0x24   : > { %1183 = vmatpush3.bf16.msra.mxu0 %v1285_v5 }
  0x25   : > { %1195 = vmatpush3.bf16.msra.mxu1 %v1291_v8  ;;  %1208 = vmatprep.subr.bf16.mxu0 %v1296_v14 }
  0x26   : > { %1196 = vmatprep.subr.bf16.mxu1 %v1292_v10 }
  0x27   : > { %1185 = vmatmul.mubr.msk.bf16.vlgmr.msra.gmra.mxu0 %vm496_vm0, %v1287_v9 }
  0x28   : > { %1209 = vmatpush3.bf16.msra.mxu0 %v1296_v14 }
  0x29   : > { %1197 = vmatpush3.bf16.msra.mxu1 %v1292_v10  ;;  %1210 = vmatprep.subr.bf16.mxu0 %v1297_v30 }
  0x2a   : > { %1198 = vmatprep.subr.bf16.mxu1 %v1293_v11 }
  0x2c   : > { %1211 = vmatpush3.bf16.msra.mxu0 %v1297_v30 }
  0x2d   : > { %1199 = vmatpush3.bf16.msra.mxu1 %v1293_v11  ;;  %1212 = vmatprep.subr.bf16.mxu0 %v1298_v31 }
  0x2e   : > { %1200 = vmatprep.subr.bf16.mxu1 %v1294_v12 }
  0x30   : > { %1213 = vmatpush3.bf16.msra.mxu0 %v1298_v31 }
  0x31   : > { %1201 = vmatpush3.bf16.msra.mxu1 %v1294_v12  ;;  %1214 = vmatprep.subr.bf16.mxu0 %v1299_v32 }
  0x32   : > { %1202 = vmatprep.subr.bf16.mxu1 %v1295_v13 }
  0x34   : > { %1215 = vmatpush3.bf16.msra.mxu0 %v1299_v32 }
  0x35   : > { %1203 = vmatpush3.bf16.msra.mxu1 %v1295_v13  ;;  %1220 = vmatprep.subr.bf16.mxu0 %v1300_v48 }
  0x36   : > { %1228 = vmatprep.subr.bf16.mxu1 %v1302_v1 }
  0xe7   : > { %v1186_v15 = vpop.f32.mrf.mxu0 }
  0xe8   : > { %v546_v21 = vadd.f32 %v1186_v15, %v1101_v17 }
  0xe9   : > { %v537_v16 = vpop.f32.mrf.mxu0 }
  0xea   : > { %v538_v19 = vadd.f32 %v1101_v17, %v537_v16  ;;  %v554_v27 = vmax.f32 %v546_v21, 0.0  ;;  %v1131_v21 = vld [vmem:[%s1631_s10] ss:$0 sm:$0xff] }
  0xeb   : > { %v1187_v18 = vpop.f32.mrf.mxu0 }
  0xec   : > { %v549_v20 = vadd.f32 %v1187_v18, %v1101_v17  ;;  %v552_v25 = vmax.f32 %v538_v19, 0.0 }
  0xed   : > { %v540_v22 = vpop.f32.mrf.mxu0 }
  0xee   : > { %v541_v23 = vadd.f32 %v1101_v17, %v540_v22  ;;  %v555_v24 = vmax.f32 %v549_v20, 0.0  ;;  %v946_v17 = vld [vmem:[%s1632_s11] sm:$0xf] }
  0xef   : > { %v963_v18 = vsel %vm961_vm3, %v946_v17, 0 }
  0xf0   : > { %v553_v26 = vmax.f32 %v541_v23, 0.0  ;;  %v557_v29 = vpack.c.bf16 %v555_v24, %v554_v27 }
  0xf2   : > { %v556_v28 = vpack.c.bf16 %v553_v26, %v552_v25 }
  0xf4   : > { %1204 = vmatprep.mubr.bf16.mxu1 %v556_v28 }
  0xf5   : > { %1205 = vmatmul.mubr.bf16.vlgmr.msra.gmra.mxu1 %v557_v29 }
  0xf6   : > { %1229 = vmatpush3.bf16.msra.mxu1 %v1302_v1 }
 0x1b5   : > { %v1206_v33 = vpop.f32.mrf.mxu1 }
 0x1b6   : > { %v672_v39 = vadd.f32 %v1206_v33, %v1110_v35 }
 0x1b7   : > { %v663_v34 = vpop.f32.mrf.mxu1 }
 0x1b8   : > { %v664_v37 = vadd.f32 %v1110_v35, %v663_v34  ;;  %v680_v45 = vmax.f32 %v672_v39, 0.0  ;;  %v1135_v34 = vld [vmem:[%s1633_s12] ss:$0 sm:$0xff] }
 0x1b9   : > { %v1207_v36 = vpop.f32.mrf.mxu1 }
 0x1ba   : > { %v675_v38 = vadd.f32 %v1207_v36, %v1110_v35  ;;  %v678_v43 = vmax.f32 %v664_v37, 0.0 }
 0x1bb   : > { %v666_v40 = vpop.f32.mrf.mxu1 }
 0x1bc   : > { %v667_v41 = vadd.f32 %v1110_v35, %v666_v40  ;;  %v681_v42 = vmax.f32 %v675_v38, 0.0 }
 0x1be   : > { %v679_v44 = vmax.f32 %v667_v41, 0.0  ;;  %v683_v47 = vpack.c.bf16 %v681_v42, %v680_v45 }
 0x1c0   : > { %v682_v46 = vpack.c.bf16 %v679_v44, %v678_v43 }
 0x1c2   : > { %1216 = vmatprep.mubr.msk.bf16.mxu0 %vm496_vm0, %v682_v46 }
 0x1c3   : > { %1217 = vmatmul.mubr.msk.bf16.vlgmr.msra.gmra.mxu0 %vm496_vm0, %v683_v47 }
 0x1c4   : > { %1221 = vmatpush3.bf16.msra.mxu0 %v1300_v48 }
 0x1c5   : > { %1222 = vmatprep.subr.bf16.mxu0 %v1301_v49 }
 0x1c8   : > { %1223 = vmatpush3.bf16.msra.mxu0 %v1301_v49 }
 0x1c9   : > { %1240 = vmatprep.subr.msk.bf16.mxu0 %vm961_vm3, %v946_v17 }
 0x283   : > { %v1218_v50 = vpop.f32.mrf.mxu0 }
 0x284   : > { %v772_v56 = vadd.f32 %v1218_v50, %v1119_v52 }
 0x285   : > { %v763_v51 = vpop.f32.mrf.mxu0 }
 0x286   : > { %v764_v54 = vadd.f32 %v1119_v52, %v763_v51  ;;  %v780_v62 = vmax.f32 %v772_v56, 0.0 }
 0x287   : > { %v1219_v53 = vpop.f32.mrf.mxu0 }
 0x288   : > { %v775_v55 = vadd.f32 %v1219_v53, %v1119_v52  ;;  %v778_v60 = vmax.f32 %v764_v54, 0.0 }
 0x289   : > { %v766_v57 = vpop.f32.mrf.mxu0 }
 0x28a   : > { %v767_v58 = vadd.f32 %v1119_v52, %v766_v57  ;;  %v781_v59 = vmax.f32 %v775_v55, 0.0 }
 0x28c   : > { %v779_v61 = vmax.f32 %v767_v58, 0.0  ;;  %v783_v0 = vpack.c.bf16 %v781_v59, %v780_v62 }
 0x28e   : > { %v782_v63 = vpack.c.bf16 %v779_v61, %v778_v60 }
 0x290   : > { %1224 = vmatprep.mubr.msk.bf16.mxu0 %vm807_vm1, %v782_v63 }
 0x291   : > { %1225 = vmatmul.mubr.msk.bf16.vlgmr.msra.gmra.mxu0 %vm807_vm1, %v783_v0 }
 0x292   : > { %1235 = vmatpush3.bf16.msra.mxu0 %v963_v18 }
 0x351   : > { %v1226_v2 = vpop.f32.mrf.mxu0 }
 0x352   : > { %v857_v8 = vadd.f32 %v1226_v2, %v1126_v4 }
 0x353   : > { %v848_v3 = vpop.f32.mrf.mxu0 }
 0x354   : > { %v849_v6 = vadd.f32 %v1126_v4, %v848_v3  ;;  %v865_v14 = vmax.f32 %v857_v8, 0.0 }
 0x355   : > { %v1227_v5 = vpop.f32.mrf.mxu0 }
 0x356   : > { %v860_v7 = vadd.f32 %v1227_v5, %v1126_v4  ;;  %v863_v12 = vmax.f32 %v849_v6, 0.0 }
 0x357   : > { %v851_v9 = vpop.f32.mrf.mxu0 }
 0x358   : > { %v852_v10 = vadd.f32 %v1126_v4, %v851_v9  ;;  %v866_v11 = vmax.f32 %v860_v7, 0.0 }
 0x35a   : > { %v864_v13 = vmax.f32 %v852_v10, 0.0  ;;  %v868_v16 = vpack.c.bf16 %v866_v11, %v865_v14 }
 0x35c   : > { %v867_v15 = vpack.c.bf16 %v864_v13, %v863_v12 }
 0x35e   : > { %1230 = vmatprep.mubr.msk.bf16.mxu1 %vm884_vm2, %v867_v15 }
 0x35f   : > { %1231 = vmatmul.mubr.msk.bf16.vlgmr.msra.gmra.mxu1 %vm884_vm2, %v868_v16 }
 0x41f   : > { %v1232_v19 = vpop.f32.mrf.mxu1 }
 0x420   : > { %v934_v25 = vadd.f32 %v1232_v19, %v1131_v21 }
 0x421   : > { %v925_v20 = vpop.f32.mrf.mxu1 }
 0x422   : > { %v926_v23 = vadd.f32 %v1131_v21, %v925_v20  ;;  %v942_v31 = vmax.f32 %v934_v25, 0.0 }
 0x423   : > { %v1233_v22 = vpop.f32.mrf.mxu1 }
 0x424   : > { %v937_v24 = vadd.f32 %v1233_v22, %v1131_v21  ;;  %v940_v29 = vmax.f32 %v926_v23, 0.0 }
 0x425   : > { %v928_v26 = vpop.f32.mrf.mxu1 }
 0x426   : > { %v929_v27 = vadd.f32 %v1131_v21, %v928_v26  ;;  %v943_v28 = vmax.f32 %v937_v24, 0.0 }
 0x428   : > { %v941_v30 = vmax.f32 %v929_v27, 0.0  ;;  %v945_v33 = vpack.c.bf16 %v943_v28, %v942_v31 }
 0x42a   : > { %v944_v32 = vpack.c.bf16 %v941_v30, %v940_v29 }
 0x42c   : > { %1236 = vmatprep.mubr.msk.bf16.mxu0 %vm954_vm4, %v944_v32 }
 0x42d   : > { %1237 = vmatmul.mubr.msk.bf16.vlgmr.msra.gmra.mxu0 %vm954_vm4, %v945_v33 }
 0x4ed   : > { %v1238_v35 = vpop.f32.mrf.mxu0 }
 0x4ee   : > { %v1008_v36 = vadd.f32 %v1238_v35, %v1135_v34 }
 0x4ef   : > { %v999_v37 = vpop.f32.mrf.mxu0 }
 0x4f0   : > { %1016 = vst [vmem:[%s434_s16 + $0x10] sm:$0xff] %v1008_v36  ;;  %v1000_v38 = vadd.f32 %v1135_v34, %v999_v37 }
 0x4f1   : > { %v1239_v39 = vpop.f32.mrf.mxu0 }
 0x4f2   : > { %1014 = vst [vmem:[%s434_s16] sm:$0xff] %v1000_v38  ;;  %v1011_v40 = vadd.f32 %v1239_v39, %v1135_v34 }
 0x4f3   : > { %v1002_v41 = vpop.f32.mrf.mxu0 }
 0x4f4   : > { %1017 = vst [vmem:[%s434_s16 + $0x18] sm:$0xff] %v1011_v40  ;;  %v1003_v42 = vadd.f32 %v1135_v34, %v1002_v41 }
 0x4f6   : > { %1015 = vst [vmem:[%s434_s16 + $0x8] sm:$0xff] %v1003_v42 }
 0x4f7   : > { %1316 = shalt.err (!%p1313_p3)
}
 0x4f8   : > { %s1317_s27 = scalar_lea.hbm %s1579_s30, 512  ;;  %s1321_s21 = scalar_lea.hbm %s1634_s13, 1024 }
 0x4f9   : > { %p1318_p4 = scmp.ne.s32.totalorder %s1579_s30, %s1317_s27  ;;  %p1322_p9 = scmp.lt.s32.totalorder %s1579_s30, %s1634_s13 }
 0x4fa   : > { %p1323_p10 = scmp.lt.s32.totalorder %s1321_s21, %s1317_s27 }
 0x4fb   : > { %p1319_p7 = pnand %p1318_p4, %p1476_p5 }
 0x4fc   : > { %p1324_p11 = por %p1323_p10, %p1322_p9 }
 0x4fd   : > { %p1320_p8 = pneg %p1319_p7 }
 0x4ff   : > { %p1325_p12 = pnand %p1324_p11, %p1320_p8 }
 0x501   : > { %1328 = shalt.err (!%p1325_p12)
}
 0x502   : > { %s1366_s29 = smov 128   ;;  %s1367_s22 = smov 8  }
 0x503   : > { %1241 = dma.vmem_to_hbm [thread:$0]  (%p1476_p5), %s1574_s20, 512, %s1579_s30, %s1581_s17, %s1366_s29, %s1366_s29, %s1367_s22  }
 0x504 PF: > { %p1247_p13 = scmp.ge.s32.totalorder %s1363_s28, 2  ;;  %s1047_s14 = sand.u32 1, %s1351_s25  }
 0x505   : > { %s1048_s27 = scalar_lea.sflag [#allocation3], %s1047_s14 }
 0x506   : > { %p1244_p0 = pnand %p1247_p13, %p1480_p6 }
 0x508   : > { %p1245_p1 = pneg %p1244_p0 }
 0x50a   : > { %1346 = dma.done.wait (%p1245_p1), %s1048_s27, 512  }
 0x50b   : > { %1348 = vsyncadd (%p1245_p1), %s1048_s27, 4294966784  ;;  %s1646_s28 = sld [smem:[#allocation6_spill]]  ;;  %s1649_s25 = smov %s1355_s26 }
 0x50c   : > { %s1647_s19 = sld [smem:[#allocation5_spill]] }
 0x50d   : > { %s1648_s27 = sld [smem:[#allocation7_spill]] }
 0x511   : > { %p23_p2 = scmp.ge.s32.totalorder %s1646_s28, 4  }
 0x512   : > { %s1650_s26 = smov %s1647_s19 }
 0x513   :  { %25 = sbr.rel (!%p23_p2) target bundleno = 3 (0x3), region = 107 }
 0x518   :  { %1053 = vsyncpa [#allocation3], 1 }
 0x519   :  { %1055 = vsyncpa [#allocation3 + $0x1], 1 }

</bundles_post_ra>
